<compile_context>
chip_gen: v5e
topology: v5e:2x2
jax: 0.10.0
libtpu: 0.0.40
codegen_flags: <defaults>
</compile_context>

<pallas_src>
import functools

import jax
import jax.numpy as jnp
from jax import lax
from jax.experimental import pallas as pl
from jax.experimental.pallas import tpu as pltpu


# ---------------------------------------------------------------------------
# small helpers
# ---------------------------------------------------------------------------
def _round_up(x, m):
    return ((x + m - 1) // m) * m


def _int_pow(x, n: int):
    """x**n for a static positive int n, by squaring (log2(n) multiplies)."""
    result = None
    base = x
    while True:
        if n & 1:
            result = base if result is None else result * base
        n >>= 1
        if n == 0:
            return result
        base = base * base


def _neuron_block(n, cap, sublane_aligned=False):
    """Largest divisor of n that is <= cap (optionally a multiple of 8 or == n)."""
    cap = max(1, min(cap, n))
    for d in range(cap, 0, -1):
        if n % d != 0:
            continue
        if sublane_aligned and d != n and d % 8 != 0:
            continue
        return d
    return n


# ---------------------------------------------------------------------------
# Pallas kernels
# ---------------------------------------------------------------------------
def _poly_full_kernel(bias_ref, x_ref, zt_ref, o_ref, *, degree):
    """One (k, neuron-block, T-tile, Tz-tile) step.

    bias_ref : (NB, 1, 1)       VMEM
    x_ref    : (NB, TT, D)      VMEM   (lhs, contraction on last dim)
    zt_ref   : (NB, D, TZ)      VMEM   (rhs, contraction-natural layout)
    o_ref    : (NB, TT, TZ)     VMEM   (lane-dense: TZ is a multiple of 128)
    """
    dots = lax.dot_general(
        x_ref[...], zt_ref[...],
        dimension_numbers=(((2,), (1,)), ((0,), (0,))),
        preferred_element_type=jnp.float32,
    )
    base = bias_ref[...] + dots                     # (NB,1,1) + (NB,TT,TZ)
    o_ref[...] = _int_pow(base, degree).astype(o_ref.dtype)


def _poly_diag_kernel(bias_ref, xt_ref, o_ref, *, degree):
    """Diagonal path, one (k, neuron-block, T-tile) step.

    bias_ref : (NB, 1)     VMEM
    xt_ref   : (NB, D, TT) VMEM   (T in lanes, D in sublanes)
    o_ref    : (NB, TT)    VMEM   (lane-dense: TT multiple of 128)
    """
    x = xt_ref[...]
    sq = jnp.sum(x * x, axis=-2)                    # reduce over D -> (NB, TT)
    base = bias_ref[...] + sq                       # (NB,1) + (NB,TT)
    o_ref[...] = _int_pow(base, degree).astype(o_ref.dtype)


# ---------------------------------------------------------------------------
# Module (parameter setup + layout plumbing in plain JAX, hot path in Pallas)
# ---------------------------------------------------------------------------
class Polynomial:
    """JAX/Pallas port of the neuroprob Polynomial kernel."""

    _VMEM_LIMIT = 32 * 1024 * 1024   # safe on v5e / v6e / v7x

    def __init__(self, input_dims, bias, degree=1, track_dims=None, f="exp",
                 dtype=jnp.float32):
        if track_dims is None:
            track_dims = list(range(input_dims))
        elif input_dims != len(track_dims):
            raise ValueError("Input size and the length of active dims must match.")
        self.input_dims = input_dims
        self.track_dims = track_dims
        self.dtype = dtype

        if f == "exp":
            self.lf = jnp.exp
            self.lf_inv = jnp.log
        elif f == "softplus":
            self.lf = jax.nn.softplus
            self.lf_inv = lambda x: jnp.where(x > 30, x, jnp.log(jnp.exp(x) - 1.0))
        elif f == "relu":
            self.lf = lambda x: jnp.clip(x, 0)
            self.lf_inv = lambda x: x
        else:
            raise NotImplementedError("Link function is not supported.")

        if not isinstance(degree, int) or degree < 1:
            raise ValueError("Degree must be a positive integer.")
        self.degree = degree

        # Parameter stored in unconstrained space, like the PyTorch module.
        self._bias = self.lf_inv(jnp.asarray(bias, dtype=dtype))   # (N,)

    @property
    def bias(self):
        return self.lf(self._bias)   # (N,), positive

    def _slice_input(self, X):
        if X.ndim != 4:
            raise ValueError("Input X must be of shape (K x N x T x D).")
        return X[..., self.track_dims]

    def __call__(self, X, Z=None, diag=False):
        X = self._slice_input(X)
        if diag:
            return self._forward_diag(X)
        Z = X if Z is None else self._slice_input(Z)
        if X.shape[-1] != Z.shape[-1]:
            raise ValueError("Inputs must have the same number of features.")
        return self._forward_full(X, Z)

    # ------------------------------------------------------------------
    # full covariance: grid over (K, neuron-block, T-tile, Tz-tile)
    # ------------------------------------------------------------------
    def _forward_full(self, X, Z):
        K, N, T, D = X.shape
        Tz = Z.shape[2]
        dtype = X.dtype
        bias = self.bias.astype(dtype).reshape(N, 1, 1)

        # Tile sizes: sublane-aligned T tile, lane-dense (multiple of 128) Tz tile.
        t8 = _round_up(T, 8)
        tile_t = t8 if t8 <= 512 else 256
        tz128 = _round_up(Tz, 128)
        tile_tz = tz128 if tz128 <= 512 else 512
        Tp = _round_up(T, tile_t)
        Tzp = _round_up(Tz, tile_tz)

        # Batch neurons so each grid step writes >= ~512 KiB of output.
        out_tile_bytes = tile_t * tile_tz * 4
        nb = _neuron_block(N, max(1, (512 * 1024) // out_tile_bytes))

        Xp = X if Tp == T else jnp.pad(X, ((0, 0), (0, 0), (0, Tp - T), (0, 0)))
        Zt = jnp.swapaxes(Z, -1, -2)                         # (K, N, D, Tz)
        if Tzp != Tz:
            Zt = jnp.pad(Zt, ((0, 0), (0, 0), (0, 0), (0, Tzp - Tz)))

        grid = (K, N // nb, Tp // tile_t, Tzp // tile_tz)
        kernel = functools.partial(_poly_full_kernel, degree=self.degree)

        out = pl.pallas_call(
            kernel,
            out_shape=jax.ShapeDtypeStruct((K, N, Tp, Tzp), dtype),
            grid=grid,
            in_specs=[
                pl.BlockSpec((nb, 1, 1),
                             lambda k, n, ti, tj: (n, 0, 0)),
                pl.BlockSpec((pl.Squeezed(), nb, tile_t, D),
                             lambda k, n, ti, tj: (k, n, ti, 0)),
                pl.BlockSpec((pl.Squeezed(), nb, D, tile_tz),
                             lambda k, n, ti, tj: (k, n, 0, tj)),
            ],
            out_specs=pl.BlockSpec((pl.Squeezed(), nb, tile_t, tile_tz),
                                   lambda k, n, ti, tj: (k, n, ti, tj)),
            compiler_params=pltpu.CompilerParams(
                dimension_semantics=("parallel",) * 4,
                vmem_limit_bytes=self._VMEM_LIMIT),
        )(bias, Xp, Zt)

        if Tp != T or Tzp != Tz:
            out = out[:, :, :T, :Tz]
        return out

    # ------------------------------------------------------------------
    # diagonal: grid over (K, neuron-block, T-tile), T in the lane dim
    # ------------------------------------------------------------------
    def _forward_diag(self, X):
        K, N, T, D = X.shape
        dtype = X.dtype
        bias = self.bias.astype(dtype).reshape(N, 1)

        t128 = _round_up(T, 128)
        tile_t = t128 if t128 <= 1024 else 512
        Tp = _round_up(T, tile_t)

        # Output block second-to-last dim must be a multiple of 8 or full N.
        nb = _neuron_block(N, max(1, (256 * 1024) // (tile_t * 4)),
                           sublane_aligned=True)

        # Layout plumbing: T in lanes, D (small) in sublanes.
        Xt = jnp.swapaxes(X, -1, -2)                         # (K, N, D, T)
        if Tp != T:
            Xt = jnp.pad(Xt, ((0, 0), (0, 0), (0, 0), (0, Tp - T)))

        grid = (K, N // nb, Tp // tile_t)
        kernel = functools.partial(_poly_diag_kernel, degree=self.degree)

        out = pl.pallas_call(
            kernel,
            out_shape=jax.ShapeDtypeStruct((K, N, Tp), dtype),
            grid=grid,
            in_specs=[
                pl.BlockSpec((nb, 1),
                             lambda k, n, ti: (n, 0)),
                pl.BlockSpec((pl.Squeezed(), nb, D, tile_t),
                             lambda k, n, ti: (k, n, 0, ti)),
            ],
            out_specs=pl.BlockSpec((pl.Squeezed(), nb, tile_t),
                                   lambda k, n, ti: (k, n, ti)),
            compiler_params=pltpu.CompilerParams(
                dimension_semantics=("parallel",) * 3,
                vmem_limit_bytes=self._VMEM_LIMIT),
        )(bias, Xt)

        if Tp != T:
            out = out[:, :, :T]
        return out


# ---------------------------------------------------------------------------
# Demo / correctness check
# ---------------------------------------------------------------------------
if __name__ == "__main__":
    key = jax.random.PRNGKey(0)
    kx, kz, kb = jax.random.split(key, 3)

    # (samples, neurons, timesteps, input dims)
    K, N, T, D = 2, 4, 16, 4
    degree = 2

    X = jax.random.normal(kx, (K, N, T, D), dtype=jnp.float32)
    bias_init = 0.5 + jax.random.uniform(kb, (N,), dtype=jnp.float32)  # positive

    kern = Polynomial(input_dims=D, bias=bias_init, degree=degree, f="exp")
    b = kern.bias

    # --- full covariance (self) ---
    cov = jax.block_until_ready(kern(X))                      # (K, N, T, T)
    ref_cov = (b[None, :, None, None]
               + jnp.einsum("kntd,knsd->knts", X, X)) ** degree
    assert cov.shape == (K, N, T, T) and cov.dtype == jnp.float32
    assert jnp.allclose(cov, ref_cov, rtol=1e-5, atol=1e-5)

    # --- diagonal ---
    var = jax.block_until_ready(kern(X, diag=True))           # (K, N, T)
    ref_var = (b[None, :, None] + jnp.sum(X * X, axis=-1)) ** degree
    assert var.shape == (K, N, T) and var.dtype == jnp.float32
    assert jnp.allclose(var, ref_var, rtol=1e-5, atol=1e-5)

    # --- cross covariance with non-aligned shapes (exercises padding path) ---
    T2, Tz2 = 40, 24
    kern3 = Polynomial(input_dims=D, bias=bias_init, degree=3, f="exp")
    X2 = jax.random.normal(kx, (K, N, T2, D), dtype=jnp.float32)
    Z2 = jax.random.normal(kz, (K, N, Tz2, D), dtype=jnp.float32)
    cov2 = jax.block_until_ready(kern3(X2, Z2))               # (K, N, T2, Tz2)
    ref_cov2 = (kern3.bias[None, :, None, None]
                + jnp.einsum("kntd,knsd->knts", X2, Z2)) ** 3
    assert cov2.shape == (K, N, T2, Tz2)
    assert jnp.allclose(cov2, ref_cov2, rtol=1e-5, atol=1e-5)

    print("KERNEL_OK")
</pallas_src>

<mosaic_0001>
module attributes {stable_mosaic.version = 11 : i64} {
  func.func @_poly_full_kernel(%arg0: i32, %arg1: i32, %arg2: i32, %arg3: i32, %arg4: memref<4x1x1xf32, #tpu.memory_space<vmem>>, %arg5: memref<1x4x16x4xf32, #tpu.memory_space<vmem>>, %arg6: memref<1x4x4x128xf32, #tpu.memory_space<vmem>>, %arg7: memref<1x4x16x128xf32, #tpu.memory_space<vmem>>) attributes {dimension_semantics = [#tpu.dimension_semantics<parallel>, #tpu.dimension_semantics<parallel>, #tpu.dimension_semantics<parallel>, #tpu.dimension_semantics<parallel>], iteration_bounds = array<i64: 2, 1, 1, 1>, scalar_prefetch = 0 : i64, scratch_operands = 0 : i64, tpu.core_type = #tpu.core_type<tc>, window_params = [{transform_indices = @transform_0, window_bounds = array<i64: 4, 1, 1>}, {transform_indices = @transform_1, window_bounds = array<i64: 1, 4, 16, 4>}, {transform_indices = @transform_2, window_bounds = array<i64: 1, 4, 4, 128>}, {transform_indices = @transform_3, window_bounds = array<i64: 1, 4, 16, 128>}]} {
    %c0 = arith.constant 0 : index
    %c0_0 = arith.constant 0 : index
    %c0_1 = arith.constant 0 : index
    %c0_2 = arith.constant 0 : index
    %0 = vector.load %arg5[%c0, %c0_0, %c0_1, %c0_2] : memref<1x4x16x4xf32, #tpu.memory_space<vmem>>, vector<1x4x16x4xf32>
    %1 = vector.shape_cast %0 : vector<1x4x16x4xf32> to vector<4x16x4xf32>
    %c0_3 = arith.constant 0 : index
    %c0_4 = arith.constant 0 : index
    %c0_5 = arith.constant 0 : index
    %c0_6 = arith.constant 0 : index
    %2 = vector.load %arg6[%c0_3, %c0_4, %c0_5, %c0_6] : memref<1x4x4x128xf32, #tpu.memory_space<vmem>>, vector<1x4x4x128xf32>
    %3 = vector.shape_cast %2 : vector<1x4x4x128xf32> to vector<4x4x128xf32>
    %cst = arith.constant dense<0.000000e+00> : vector<4x16x128xf32>
    %4 = tpu.matmul %1, %3, %cst {dimension_numbers = #tpu.dot_dimension_numbers<[2], [1], [1], [2], [0, 0, 0, 1, 1, 2], [0], [0]>} : vector<4x16x4xf32>, vector<4x4x128xf32>, vector<4x16x128xf32> -> vector<4x16x128xf32>
    %c0_7 = arith.constant 0 : index
    %c0_8 = arith.constant 0 : index
    %c0_9 = arith.constant 0 : index
    %5 = vector.load %arg4[%c0_7, %c0_8, %c0_9] : memref<4x1x1xf32, #tpu.memory_space<vmem>>, vector<4x1x1xf32>
    %6 = vector.broadcast %5 : vector<4x1x1xf32> to vector<4x16x128xf32>
    %7 = arith.addf %6, %4 : vector<4x16x128xf32>
    %8 = arith.mulf %7, %7 : vector<4x16x128xf32>
    %c0_10 = arith.constant 0 : index
    %c0_11 = arith.constant 0 : index
    %c0_12 = arith.constant 0 : index
    %c0_13 = arith.constant 0 : index
    %9 = vector.load %arg7[%c0_10, %c0_11, %c0_12, %c0_13] : memref<1x4x16x128xf32, #tpu.memory_space<vmem>>, vector<1x4x16x128xf32>
    %10 = vector.shape_cast %9 : vector<1x4x16x128xf32> to vector<4x16x128xf32>
    %11 = vector.shape_cast %8 : vector<4x16x128xf32> to vector<1x4x16x128xf32>
    tpu.vector_store %arg7[%c0_10, %c0_11, %c0_12, %c0_13], %11 {strides = array<i32>} : memref<1x4x16x128xf32, #tpu.memory_space<vmem>>, vector<1x4x16x128xf32>,
    return
  }
  func.func @transform_0(%arg0: i32, %arg1: i32, %arg2: i32, %arg3: i32) -> (i32, i32, i32) {
    %c0_i32 = arith.constant 0 : i32
    %c0_i32_0 = arith.constant 0 : i32
    %c0_i32_1 = arith.constant 0 : i32
    return %arg1, %c0_i32, %c0_i32_0 : i32, i32, i32
  }
  func.func @transform_1(%arg0: i32, %arg1: i32, %arg2: i32, %arg3: i32) -> (i32, i32, i32, i32) {
    %c0_i32 = arith.constant 0 : i32
    %c0_i32_0 = arith.constant 0 : i32
    return %arg0, %arg1, %arg2, %c0_i32 : i32, i32, i32, i32
  }
  func.func @transform_2(%arg0: i32, %arg1: i32, %arg2: i32, %arg3: i32) -> (i32, i32, i32, i32) {
    %c0_i32 = arith.constant 0 : i32
    %c0_i32_0 = arith.constant 0 : i32
    return %arg0, %arg1, %c0_i32, %arg3 : i32, i32, i32, i32
  }
  func.func @transform_3(%arg0: i32, %arg1: i32, %arg2: i32, %arg3: i32) -> (i32, i32, i32, i32) {
    %c0_i32 = arith.constant 0 : i32
    return %arg0, %arg1, %arg2, %arg3 : i32, i32, i32, i32
  }
}

</mosaic_0001>

<bundles_post_ra>
// kernel: tpu_custom_call.1
= control target key start
LH: loop header
LB: loop body
LE: loop exit
PB: predicated region body
PF: predicated region fallthrough
CT: control target
= control target key end

     0   :  { %8 = vsyncpa [#allocation3], 0  ;;  %s980_s0 = inlined_call_operand.vmem [shape: f32[4,1,1], index: 0, kind: input, shape index: {}]   ;;  %s981_s1 = inlined_call_operand.vmem [shape: f32[2,4,16,4], index: 1, kind: input, shape index: {}]   ;;  %s982_s2 = inlined_call_operand.vmem [shape: f32[2,4,4,128], index: 2, kind: input, shape index: {}]   ;;  %s983_s3 = inlined_call_operand.hbm [shape: f32[2,4,16,128], index: 3, kind: output, shape index: {}]  }
   0x1   :  { %10 = vsyncpa [#allocation3 + $0x1], 0  ;;  %s845_s12 = smov 0   ;;  %s847_s13 = smov 0  }
   0x2   :  { %s849_s14 = smov 0   ;;  %s851_s15 = smov 0  }
   0x3   :  { %s853_s16 = smov 0   ;;  %s855_s17 = smov 0  }
   0x4 LB: > { %s647_s18 = sadd.s32 4294967295, %s820_s17   ;;  %s648_s19 = sadd.s32 4294967294, %s820_s17   ;;  %s820_s17 = sphi %s855_s17, %s16_s17   ;;  %s816_s16 = sphi %s853_s16, %s990_s16   ;;  %s812_s15 = sphi %s851_s15, %s989_s15   ;;  %s808_s14 = sphi %s849_s14, %s988_s14   ;;  %s804_s13 = sphi %s847_s13, %s987_s13   ;;  %s800_s12 = sphi %s845_s12, %s986_s12  }
   0x5   : > { %s42_s20 = sadd.s32 1, %s816_s16  ;;  %s141_s21 = sadd.s32 1, %s808_s14 }
   0x6   : > { %p44_p0 = scmp.ge.s32.totalorder %s42_s20, 2  ;;  %p151_p1 = scmp.ne.s32.totalorder %s808_s14, %s804_s13 }
   0x7   : > { %p152_p2 = scmp.eq.s32.totalorder %s647_s18, 1  ;;  %p157_p3 = scmp.ne.s32.totalorder %s804_s13, %s800_s12 }
   0x8   : > { %s992_s20 = smov (%p44_p0, %s42_s20), 0  ;;  %p158_p5 = scmp.eq.s32.totalorder %s648_s19, 1 }
   0x9   : > { %p885_p4 = por %p152_p2, %p151_p1  ;;  %s132_s23 = ssub.s32 %s816_s16, %s992_s20 }
   0xa   : > { %p652_p6 = scmp.ge.s32.totalorder %s820_s17, 1  ;;  %p139_p7 = scmp.eq.s32.totalorder %s132_s23, 0 }
   0xb   : > { %p892_p8 = por %p158_p5, %p157_p3  ;;  %p219_p9 = scmp.lt.s32.totalorder %s820_s17, 3 }
   0xc   : > { %s898_s25 = scalar_select %p139_p7, %s808_s14, %s141_s21  }
   0xd   : > { %p220_p10 = pnand %p652_p6, %p219_p9 }
   0xe   : > { %p275_p11 = scmp.lt.s32.totalorder (!%p220_p10), %s812_s15, 1  ;;  %s265_s26 = sand.u32 (!%p220_p10), 1, %s804_s13  }
   0xf   : > { %223 = sbr.rel (%p220_p10) target bundleno = 177 (0xb1), region = 32  ;;  %s653_s27 = sshll.u32 (!%p220_p10), %s265_s26, 6 }
  0x10   : > { %s931_s28 = scalar_lea.vmem (!%p220_p10), [#allocation2], %s653_s27  ;;  %s677_s29 = sshll.u32 (!%p220_p10), %s812_s15, 6 }
  0x11   : > { %s517_s6 = sshll.u32 (!%p220_p10), %s931_s28, 4  ;;  %s499_s7 = scalar_lea.sflag (!%p220_p10), [#allocation3], %s265_s26  ;;  %s518_s6 = int_to_ptr.vmem [resolvable:$true] %s517_s6 }
  0x12   : > { %s762_s18 = scalar_lea.hbm (!%p220_p10), %s983_s3, 128 }
  0x14   : > { %v822_v0 = vmov 0   ;;  %v738_v1 = vld [vmem:[%s980_s0 + $0x2] ss:$0 sm:$0xff]  ;;  %v739_v2 = vld [vmem:[%s980_s0] ss:$0 sm:$0xff]  ;;  %s276_s30 = scalar_select %p275_p11, %s812_s15, 1 }
  0x15   : > { %737 = vset.pattern.permute.xlu1 %v822_v0  ;;  %736 = vset.pattern.permute.xlu0 %v822_v0  ;;  %vm323_vm0 = vcmask 1043456   ;;  %vm316_vm1 = vcmask 31744   ;;  %v740_v3 = vld [vmem:[%s980_s0 + $0x3] ss:$0 sm:$0xff]  ;;  %v741_v4 = vld [vmem:[%s980_s0 + $0x1] ss:$0 sm:$0xff] }
  0x16   : > { %467 = vperm.xlu1 %737, %v738_v1   ;;  %459 = vperm.xlu0 %736, %v739_v2   ;;  %s675_s4 = sshll.u32 %s276_s30, 6  ;;  %s676_s5 = sshll.u32 %s276_s30, 4 }
  0x17   : > { %s286_s8 = scalar_lea.vmem %s981_s1, %s675_s4  ;;  %s300_s11 = scalar_lea.vmem %s982_s2, %s676_s5 }
  0x18   : > { %v312_v5 = vld [vmem:[%s300_s11] sm:$0xf]  ;;  %v313_v6 = vld [vmem:[%s300_s11 + $0x4] sm:$0xf]  ;;  %v314_v7 = vld [vmem:[%s300_s11 + $0x8] sm:$0xf]  ;;  %s516_s5 = scalar_lea.hbm %s983_s3, %s677_s29 }
  0x19   : > { %658 = vmatpush.msk.msra.mxu0 %vm323_vm0, %v312_v5  ;;  %661 = vmatpush.msk.msra.mxu1 %vm323_vm0, %v313_v6  ;;  %v315_v8 = vld [vmem:[%s300_s11 + $0xc] sm:$0xf]  ;;  %v304_v9 = vld [vmem:[%s286_s8] sm:$0xff]  ;;  %v306_v10 = vld [vmem:[%s286_s8 + $0x10] sm:$0xff]  ;;  %s519_s15 = sshll.u32 %s516_s5, 4  ;;  %s520_s15 = int_to_ptr.hbm [resolvable:$true] %s519_s15 }
  0x1a   : > { %664 = vmatpush.msk.msra.mxu2 %vm323_vm0, %v314_v7  ;;  %667 = vmatpush.msk.msra.mxu3 %vm323_vm0, %v315_v8  ;;  %v308_v11 = vld [vmem:[%s286_s8 + $0x20] sm:$0xff]  ;;  %v310_v12 = vld [vmem:[%s286_s8 + $0x30] sm:$0xff]  ;;  %v305_v13 = vld [vmem:[%s286_s8 + $0x8] sm:$0xff] }
  0x1b   : > { %659 = vmatmul.msk.f32.vlgmr.msra.gmra.mxu0 %vm316_vm1, %v304_v9  ;;  %662 = vmatmul.msk.f32.vlgmr.msra.gmra.mxu1 %vm316_vm1, %v306_v10  ;;  %v307_v14 = vld [vmem:[%s286_s8 + $0x18] sm:$0xff]  ;;  %v309_v15 = vld [vmem:[%s286_s8 + $0x28] sm:$0xff] }
  0x1c   : > { %665 = vmatmul.msk.f32.vlgmr.msra.gmra.mxu2 %vm316_vm1, %v308_v11  ;;  %668 = vmatmul.msk.f32.vlgmr.msra.gmra.mxu3 %vm316_vm1, %v310_v12  ;;  %v311_v16 = vld [vmem:[%s286_s8 + $0x38] sm:$0xff]  ;;  %s756_s8 = sshra.s32 %s520_s15, 4  ;;  %s757_s8 = int_to_ptr.hbm [resolvable:$true] %s756_s8 }
  0x1d   : > { %s758_s9 = scalar_lea.hbm %s757_s8, 64  ;;  %p763_p1 = scmp.lt.s32.totalorder %s757_s8, %s983_s3 }
  0x1e   : > { %471 = vperm.xlu1 %737, %v740_v3   ;;  %463 = vperm.xlu0 %736, %v741_v4   ;;  %p759_p12 = scmp.ne.s32.totalorder %s757_s8, %s758_s9  ;;  %p764_p2 = scmp.lt.s32.totalorder %s762_s18, %s758_s9 }
  0x20   : > { %p760_p13 = pnand %p759_p12, %p885_p4  ;;  %p765_p3 = por %p764_p2, %p763_p1 }
  0x22   : > { %p761_p0 = pneg %p760_p13 }
  0x23   : > { %660 = vmatmul.msk.f32.gmra.mxu0 %vm316_vm1, %v305_v13  ;;  %663 = vmatmul.msk.f32.gmra.mxu1 %vm316_vm1, %v307_v14 }
  0x24   : > { %666 = vmatmul.msk.f32.gmra.mxu2 %vm316_vm1, %v309_v15  ;;  %669 = vmatmul.msk.f32.gmra.mxu3 %vm316_vm1, %v311_v16  ;;  %p766_p5 = pnand %p765_p3, %p761_p0 }
  0x88   : > { %v460_v17 = vpop.permute.xlu0 %459  ;;  %v468_v18 = vpop.permute.xlu1 %467 }
  0x90   : > { %v464_v19 = vpop.permute.xlu0 %463  ;;  %v472_v26 = vpop.permute.xlu1 %471 }
  0x98   : > { %v344_v20 = vpop.f32.mrf.mxu0  ;;  %v376_v21 = vpop.f32.mrf.mxu1 }
  0x99   : > { %v474_v22 = vadd.f32 %v460_v17, %v344_v20  ;;  %v476_v23 = vadd.f32 %v464_v19, %v376_v21 }
  0x9b   : > { %v482_v24 = vmul.f32 %v474_v22, %v474_v22  ;;  %v484_v25 = vmul.f32 %v476_v23, %v476_v23 }
  0x9d   : > { %490 = vst [vmem:[%s931_s28] sm:$0xff] %v482_v24 }
  0x9e   : > { %492 = vst [vmem:[%s931_s28 + $0x10] sm:$0xff] %v484_v25 }
  0x9f   : > { %v408_v27 = vpop.f32.mrf.mxu2  ;;  %v440_v28 = vpop.f32.mrf.mxu3 }
  0xa0   : > { %v478_v29 = vadd.f32 %v468_v18, %v408_v27  ;;  %v480_v30 = vadd.f32 %v472_v26, %v440_v28  ;;  %v347_v31 = vpop.f32.mrf.mxu0  ;;  %v379_v32 = vpop.f32.mrf.mxu1 }
  0xa1   : > { %v475_v33 = vadd.f32 %v460_v17, %v347_v31  ;;  %v477_v34 = vadd.f32 %v464_v19, %v379_v32 }
  0xa2   : > { %v486_v35 = vmul.f32 %v478_v29, %v478_v29  ;;  %v488_v36 = vmul.f32 %v480_v30, %v480_v30 }
  0xa3   : > { %v483_v37 = vmul.f32 %v475_v33, %v475_v33  ;;  %v485_v38 = vmul.f32 %v477_v34, %v477_v34 }
  0xa4   : > { %494 = vst [vmem:[%s931_s28 + $0x20] sm:$0xff] %v486_v35 }
  0xa5   : > { %496 = vst [vmem:[%s931_s28 + $0x30] sm:$0xff] %v488_v36 }
  0xa6   : > { %491 = vst [vmem:[%s931_s28 + $0x8] sm:$0xff] %v483_v37 }
  0xa7   : > { %493 = vst [vmem:[%s931_s28 + $0x18] sm:$0xff] %v485_v38  ;;  %v411_v39 = vpop.f32.mrf.mxu2  ;;  %v443_v40 = vpop.f32.mrf.mxu3 }
  0xa8   : > { %v479_v41 = vadd.f32 %v468_v18, %v411_v39  ;;  %v481_v42 = vadd.f32 %v472_v26, %v443_v40 }
  0xaa   : > { %v487_v43 = vmul.f32 %v479_v41, %v479_v41  ;;  %v489_v44 = vmul.f32 %v481_v42, %v481_v42 }
  0xac   : > { %495 = vst [vmem:[%s931_s28 + $0x28] sm:$0xff] %v487_v43 }
  0xad   : > { %497 = vst [vmem:[%s931_s28 + $0x38] sm:$0xff] %v489_v44 }
  0xae   : > { %769 = shalt.err (!%p766_p5)
}
  0xaf   : > { %s823_s23 = smov 128   ;;  %s824_s26 = smov 8  }
  0xb0   : > { %678 = dma.vmem_to_hbm [thread:$0]  (%p885_p4), %s518_s6, 1024, %s520_s15, %s499_s7, %s823_s23, %s823_s23, %s824_s26  }
  0xb1 PF: > { %p684_p6 = scmp.ge.s32.totalorder %s820_s17, 2  ;;  %s534_s27 = sand.u32 1, %s800_s12  }
  0xb2   : > { %s535_s28 = scalar_lea.sflag [#allocation3], %s534_s27 }
  0xb3   : > { %p681_p7 = pnand %p684_p6, %p892_p8 }
  0xb5   : > { %p682_p9 = pneg %p681_p7 }
  0xb7   : > { %795 = dma.done.wait (%p682_p9), %s535_s28, 1024  }
  0xb8   : > { %797 = vsyncadd (%p682_p9), %s535_s28, 4294966272  ;;  %s16_s17 = sadd.s32 1, %s820_s17   ;;  %s986_s12 = smov %s804_s13 }
  0xb9   : > { %p13_p10 = scmp.ge.s32.totalorder %s16_s17, 4   ;;  %s987_s13 = smov %s808_s14 }
  0xba   : > { %s988_s14 = smov %s898_s25  ;;  %s989_s15 = smov %s816_s16 }
  0xbb   : > { %s990_s16 = smov %s992_s20  ;;  %15 = sbr.rel (!%p13_p10) target bundleno = 4 (0x4), region = 73 }
  0xc0   :  { %541 = vsyncpa [#allocation3], 1 }
  0xc1   :  { %543 = vsyncpa [#allocation3 + $0x1], 1 }

</bundles_post_ra>
